<compile_context>
chip_gen: v7x
topology: tpu7x:2x2x1
jax: 0.10.0
libtpu: 0.0.40
codegen_flags: <defaults>
</compile_context>

<pallas_src>
import functools
from collections import OrderedDict

import jax
import jax.numpy as jnp
from jax.experimental import pallas as pl
from jax.experimental.pallas import tpu as pltpu


# ----------------------------- fused Pallas kernel ---------------------------
def _fused_mlp_kernel(x_ref, wbe_ref, wbd_ref, enc_ref, dec_ref, *, in_f, hid_f):
    # x_ref:   (B, in_f)            f32
    # wbe_ref: (in_f + 1, hid_f)    f32   -- last row is the encoder bias
    # wbd_ref: (hid_f + 1, out_f)   f32   -- last row is the decoder bias
    # enc_ref: (B, hid_f)           f32
    # dec_ref: (B, out_f)           f32
    x = x_ref[...]

    # encoder piece: Linear + ReLU (bf16 operands, f32 MXU accumulation)
    w_enc = wbe_ref[:in_f, :].astype(jnp.bfloat16)
    b_enc = wbe_ref[in_f:in_f + 1, :]                      # f32 (1, hid_f)
    h = jnp.dot(x.astype(jnp.bfloat16), w_enc,
                preferred_element_type=jnp.float32)
    h = jnp.maximum(h + b_enc, 0.0)                        # bias add / ReLU in f32
    enc_ref[...] = h.astype(enc_ref.dtype)

    # decoder piece: Linear — encoder activation stays in vregs/VMEM
    w_dec = wbd_ref[:hid_f, :].astype(jnp.bfloat16)
    b_dec = wbd_ref[hid_f:hid_f + 1, :]                    # f32 (1, out_f)
    y = jnp.dot(h.astype(jnp.bfloat16), w_dec,
                preferred_element_type=jnp.float32) + b_dec
    dec_ref[...] = y.astype(dec_ref.dtype)


def fused_generic_model(x, wb_enc, wb_dec):
    """Single pallas_call computing both piece outputs (everything VMEM-resident)."""
    batch, in_f = x.shape
    hid_f = wb_enc.shape[1]
    out_f = wb_dec.shape[1]
    assert wb_enc.shape[0] == in_f + 1 and wb_dec.shape[0] == hid_f + 1

    vmem = pl.BlockSpec(memory_space=pltpu.MemorySpace.VMEM)
    flops = 2 * batch * (in_f * hid_f + hid_f * out_f)
    bytes_accessed = 4 * (x.size + wb_enc.size + wb_dec.size
                          + batch * hid_f + batch * out_f)

    kernel = functools.partial(_fused_mlp_kernel, in_f=in_f, hid_f=hid_f)
    enc_out, dec_out = pl.pallas_call(
        kernel,
        out_shape=(
            jax.ShapeDtypeStruct((batch, hid_f), x.dtype),
            jax.ShapeDtypeStruct((batch, out_f), x.dtype),
        ),
        in_specs=[vmem, vmem, vmem],
        out_specs=(vmem, vmem),
        cost_estimate=pl.CostEstimate(
            flops=flops, transcendentals=0, bytes_accessed=bytes_accessed),
    )(x, wb_enc, wb_dec)
    return enc_out, dec_out


# --------------------------- GenericModel forward ----------------------------
@jax.jit
def generic_model_forward(x, params):
    """Mirror of GenericModel.forward: chain pieces, return OrderedDict of outputs."""
    enc_out, dec_out = fused_generic_model(x, params["encoder"], params["decoder"])
    pieces_out = OrderedDict()
    pieces_out["encoder"] = enc_out
    pieces_out["decoder"] = dec_out
    return pieces_out


# ------------------------------ parameter init -------------------------------
def init_params(key, in_f=32, hidden_f=64):
    """Deterministic init of the two pieces' parameters (synthetic, not a checkpoint).

    Biases are folded into the weight matrices here, ONCE, as the trailing row
    (so the per-forward path carries no padding/packing ops at all).
    """
    k1, k2, k3, k4 = jax.random.split(key, 4)
    params = OrderedDict()
    # encoder: Linear(in_f -> hidden_f) + ReLU
    w_enc = jax.random.normal(k1, (in_f, hidden_f), jnp.float32) * 0.05
    b_enc = jax.random.normal(k2, (1, hidden_f), jnp.float32) * 0.01
    params["encoder"] = jnp.concatenate([w_enc, b_enc], axis=0)   # (in_f+1, hidden_f)
    # decoder: Linear(hidden_f -> in_f)
    w_dec = jax.random.normal(k3, (hidden_f, in_f), jnp.float32) * 0.05
    b_dec = jax.random.normal(k4, (1, in_f), jnp.float32) * 0.01
    params["decoder"] = jnp.concatenate([w_dec, b_dec], axis=0)   # (hidden_f+1, in_f)
    return params


# ----------------------------------- main ------------------------------------
if __name__ == "__main__":
    key = jax.random.PRNGKey(0)
    k_x, k_p = jax.random.split(key)

    batch, in_f, hidden_f = 8, 32, 64
    x = jax.random.normal(k_x, (batch, in_f), jnp.float32)
    params = init_params(k_p, in_f=in_f, hidden_f=hidden_f)

    outputs = generic_model_forward(x, params)

    # Block on all piece outputs (the OrderedDict returned by forward).
    for v in outputs.values():
        jax.block_until_ready(v)

    # Sanity check against plain-JAX f32 reference of the same pieces.
    # (bf16 MXU operands with f32 accumulation -> relaxed tolerance.)
    wb_enc, wb_dec = params["encoder"], params["decoder"]
    w_enc, b_enc = wb_enc[:in_f], wb_enc[in_f:]
    w_dec, b_dec = wb_dec[:hidden_f], wb_dec[hidden_f:]
    ref_enc = jnp.maximum(x @ w_enc + b_enc, 0.0)
    ref_dec = ref_enc @ w_dec + b_dec
    assert outputs["encoder"].shape == (batch, hidden_f)
    assert outputs["decoder"].shape == (batch, in_f)
    assert jnp.allclose(outputs["encoder"], ref_enc, atol=2e-2, rtol=2e-2)
    assert jnp.allclose(outputs["decoder"], ref_dec, atol=2e-2, rtol=2e-2)

    print("KERNEL_OK")
</pallas_src>

<mosaic_0001>
module attributes {stable_mosaic.version = 11 : i64} {
  func.func @_fused_mlp_kernel(%arg0: memref<8x32xf32, #tpu.memory_space<vmem>>, %arg1: memref<33x64xf32, #tpu.memory_space<vmem>>, %arg2: memref<65x32xf32, #tpu.memory_space<vmem>>, %arg3: memref<8x64xf32, #tpu.memory_space<vmem>>, %arg4: memref<8x32xf32, #tpu.memory_space<vmem>>) attributes {dimension_semantics = [], scalar_prefetch = 0 : i64, scratch_operands = 0 : i64, tpu.core_type = #tpu.core_type<tc>} {
    %c0 = arith.constant 0 : index
    %c0_0 = arith.constant 0 : index
    %0 = vector.load %arg0[%c0, %c0_0] : memref<8x32xf32, #tpu.memory_space<vmem>>, vector<8x32xf32>
    %c0_1 = arith.constant 0 : index
    %c0_2 = arith.constant 0 : index
    %1 = vector.load %arg1[%c0_1, %c0_2] : memref<33x64xf32, #tpu.memory_space<vmem>>, vector<32x64xf32>
    %2 = arith.truncf %1 : vector<32x64xf32> to vector<32x64xbf16>
    %c32 = arith.constant 32 : index
    %c0_3 = arith.constant 0 : index
    %3 = vector.load %arg1[%c32, %c0_3] : memref<33x64xf32, #tpu.memory_space<vmem>>, vector<1x64xf32>
    %4 = arith.truncf %0 : vector<8x32xf32> to vector<8x32xbf16>
    %cst = arith.constant dense<0.000000e+00> : vector<8x64xf32>
    %5 = tpu.matmul %4, %2, %cst {dimension_numbers = #tpu.dot_dimension_numbers<[1], [0], [0], [1], [0, 0, 1, 1], [], []>} : vector<8x32xbf16>, vector<32x64xbf16>, vector<8x64xf32> -> vector<8x64xf32>
    %6 = vector.broadcast %3 : vector<1x64xf32> to vector<8x64xf32>
    %7 = arith.addf %5, %6 : vector<8x64xf32>
    %cst_4 = arith.constant 0.000000e+00 : f32
    %8 = vector.broadcast %cst_4 : f32 to vector<8x64xf32>
    %9 = arith.maximumf %7, %8 : vector<8x64xf32>
    %c0_5 = arith.constant 0 : index
    %c0_6 = arith.constant 0 : index
    %10 = vector.load %arg3[%c0_5, %c0_6] : memref<8x64xf32, #tpu.memory_space<vmem>>, vector<8x64xf32>
    tpu.vector_store %arg3[%c0_5, %c0_6], %9 {strides = array<i32>} : memref<8x64xf32, #tpu.memory_space<vmem>>, vector<8x64xf32>,
    %c0_7 = arith.constant 0 : index
    %c0_8 = arith.constant 0 : index
    %11 = vector.load %arg2[%c0_7, %c0_8] : memref<65x32xf32, #tpu.memory_space<vmem>>, vector<64x32xf32>
    %12 = arith.truncf %11 : vector<64x32xf32> to vector<64x32xbf16>
    %c64 = arith.constant 64 : index
    %c0_9 = arith.constant 0 : index
    %13 = vector.load %arg2[%c64, %c0_9] : memref<65x32xf32, #tpu.memory_space<vmem>>, vector<1x32xf32>
    %14 = arith.truncf %9 : vector<8x64xf32> to vector<8x64xbf16>
    %cst_10 = arith.constant dense<0.000000e+00> : vector<8x32xf32>
    %15 = tpu.matmul %14, %12, %cst_10 {dimension_numbers = #tpu.dot_dimension_numbers<[1], [0], [0], [1], [0, 0, 1, 1], [], []>} : vector<8x64xbf16>, vector<64x32xbf16>, vector<8x32xf32> -> vector<8x32xf32>
    %16 = vector.broadcast %13 : vector<1x32xf32> to vector<8x32xf32>
    %17 = arith.addf %15, %16 : vector<8x32xf32>
    %c0_11 = arith.constant 0 : index
    %c0_12 = arith.constant 0 : index
    %18 = vector.load %arg4[%c0_11, %c0_12] : memref<8x32xf32, #tpu.memory_space<vmem>>, vector<8x32xf32>
    tpu.vector_store %arg4[%c0_11, %c0_12], %17 {strides = array<i32>} : memref<8x32xf32, #tpu.memory_space<vmem>>, vector<8x32xf32>,
    return
  }
}

</mosaic_0001>

<bundles_post_ra>
// kernel: generic_model_forward.1
= control target key start
LH: loop header
LB: loop body
LE: loop exit
PB: predicated region body
PF: predicated region fallthrough
CT: control target
= control target key end

     0   :  { %10 = vsyncpa [#allocation3], 0  ;;  %v253_v3 = vmov 0.0   ;;  %vm254_vm0 = vmmov 0   ;;  %s353_s0 = inlined_call_operand.vmem [shape: f32[8,32], index: 0, kind: input, shape index: {}]   ;;  %s354_s1 = inlined_call_operand.vmem [shape: f32[33,64], index: 1, kind: input, shape index: {}]   ;;  %s355_s2 = inlined_call_operand.vmem [shape: f32[65,32], index: 2, kind: input, shape index: {}]   ;;  %s356_s3 = inlined_call_operand.hbm [shape: f32[8,64], index: 3, kind: output, shape index: {0}]   ;;  %s357_s4 = inlined_call_operand.hbm [shape: f32[8,32], index: 4, kind: output, shape index: {1}]  }
   0x1   :  { %v20_v0 = vld [vmem:[%s354_s1] sm:$0xff]  ;;  %v21_v1 = vld [vmem:[%s354_s1 + $0x8] sm:$0xff]  ;;  %v22_v2 = vld [vmem:[%s354_s1 + $0x10] sm:$0xff]  ;;  %181 = vmatprep.subr.bf16.mxu0 %v253_v3  ;;  %185 = vmatprep.mubr.msk.bf16.mxu0 %vm254_vm0, %v253_v3 }
   0x2   :  { %v24_v4 = vpack.c.bf16 %v21_v1, %v20_v0  ;;  %v23_v5 = vld [vmem:[%s354_s1 + $0x18] sm:$0xff]  ;;  %v79_v6 = vld [vmem:[%s355_s2] sm:$0xff]  ;;  %189 = vmatprep.subr.bf16.mxu1 %v253_v3  ;;  %v80_v7 = vld [vmem:[%s355_s2 + $0x8] sm:$0xff]  ;;  %197 = vmatprep.mubr.msk.bf16.mxu1 %vm254_vm0, %v253_v3 }
   0x3   :  { %v81_v8 = vld [vmem:[%s355_s2 + $0x10] sm:$0xff]  ;;  %v82_v9 = vld [vmem:[%s355_s2 + $0x18] sm:$0xff]  ;;  %v25_v10 = vpack.c.bf16 %v23_v5, %v22_v2  ;;  %v19_v11 = vld [vmem:[%s353_s0] sm:$0xff]  ;;  %v87_v12 = vpack.c.bf16 %v80_v7, %v79_v6 }
   0x4   :  { %182 = vmatpush3.bf16.msra.mxu0 %v24_v4 }
   0x5   :  { %11 = vsyncpa [#allocation5], 0  ;;  %183 = vmatprep.subr.bf16.mxu0 %v253_v3  ;;  %190 = vmatpush3.bf16.msra.mxu1 %v87_v12  ;;  %v88_v13 = vpack.c.bf16 %v82_v9, %v81_v8  ;;  %v27_v14 = vpack.c.bf16 %v19_v11, %v19_v11  ;;  %vm32_vm1 = vcmask 261120   ;;  %v83_v15 = vld [vmem:[%s355_s2 + $0x20] sm:$0xff]  ;;  %v84_v16 = vld [vmem:[%s355_s2 + $0x28] sm:$0xff]  ;;  %vm77_vm2 = vcmask 523264  }
   0x6   :  { %191 = vmatprep.subr.bf16.mxu1 %v253_v3  ;;  %v89_v17 = vpack.c.bf16 %v84_v16, %v83_v15  ;;  %v85_v18 = vld [vmem:[%s355_s2 + $0x30] sm:$0xff]  ;;  %v86_v19 = vld [vmem:[%s355_s2 + $0x38] sm:$0xff]  ;;  %v169_v21 = vld [vmem:[%s354_s1 + $0x20] ss:$0 sm:$0xff]  ;;  %s255_s16 = smov [#allocation2]  }
   0x7   :  { %v90_v20 = vpack.c.bf16 %v86_v19, %v85_v18  ;;  %s147_s17 = sshll.u32 %s255_s16, 4  ;;  %s148_s17 = int_to_ptr.vmem [resolvable:$true] %s147_s17 }
   0x8   :  { %184 = vmatpush3.bf16.msra.mxu0 %v25_v10  ;;  %s205_s18 = scalar_lea.vmem %s148_s17, 128  ;;  %p210_p1 = scmp.lt.s32.totalorder %s148_s17, %s148_s17 }
   0x9   :  { %192 = vmatpush3.bf16.msra.mxu1 %v88_v13  ;;  %p206_p0 = scmp.ne.s32.totalorder %s148_s17, %s205_s18  ;;  %p211_p2 = scmp.lt.s32.totalorder %s205_s18, %s205_s18 }
   0xa   :  { %193 = vmatprep.subr.bf16.mxu1 %v253_v3 }
   0xb   :  { %186 = vmatmul.mubr.msk.bf16.vlgmr.msra.gmra.mrb[0].mxu0 %vm32_vm1, %v27_v14  ;;  %p212_p3 = por %p211_p2, %p210_p1 }
   0xd   :  { %194 = vmatpush3.bf16.msra.mxu1 %v89_v17  ;;  %p213_p4 = pnand %p212_p3, %p206_p0 }
   0xe   :  { %195 = vmatprep.subr.bf16.mxu1 %v253_v3 }
  0x11   :  { %196 = vmatpush3.bf16.msra.mxu1 %v90_v20 }
  0xde   :  { %v70_v22 = vpop.f32.mrb[0].mxu0 }
  0xdf   :  { %v71_v23 = vadd.f32 %v169_v21, %v70_v22  ;;  %v187_v24 = vpop.f32.mrb[1].mxu0 }
  0xe0   :  { %v73_v25 = vpop.f32.mrb[2].mxu0 }
  0xe1   :  { %v76_v26 = vmax.f32 %v71_v23, 0.0  ;;  %v188_v27 = vpop.f32.mrb[3].mxu0 }
  0xe3   :  { %v92_v28 = vpack.c.bf16 %v76_v26, %v76_v26  ;;  %78 = vst.msk [vmem:[#allocation2] sm:$0xff] %vm77_vm2, %v76_v26 }
  0xe5   :  { %198 = vmatmul.mubr.msk.bf16.vlgmr.msra.gmra.mrb[0].mxu1 %vm77_vm2, %v92_v28 }
  0xe6   :  { %216 = shalt.err (!%p213_p4)
}
  0xe7   :  { %s217_s20 = scalar_lea.hbm %s356_s3, 128 }
  0xe8   :  { %p218_p5 = scmp.ne.s32.totalorder %s356_s3, %s217_s20  ;;  %p221_p6 = scmp.lt.u32.totalorder %s217_s20, %s356_s3 }
  0xea   :  { %p223_p7 = pnand %p221_p6, %p218_p5 }
  0xec   :  { %226 = shalt.err (!%p223_p7)
}
  0xed   :  { %150 = dma.vmem_to_hbm [thread:$0]  %s148_s17, 128, %s356_s3, [#allocation3]   ;;  %v171_v29 = vld [vmem:[%s355_s2 + $0x40] ss:$0 sm:$0xff] }
  0xee   :  { %s256_s29 = smov [#allocation4]  }
  0xef   :  { %s157_s30 = sshll.u32 %s256_s29, 4  ;;  %s158_s30 = int_to_ptr.vmem [resolvable:$true] %s157_s30 }
  0xf0   :  { %s227_s5 = scalar_lea.vmem %s158_s30, 128  ;;  %p232_p9 = scmp.lt.s32.totalorder %s158_s30, %s158_s30 }
  0xf1   :  { %p228_p8 = scmp.ne.s32.totalorder %s158_s30, %s227_s5  ;;  %p233_p10 = scmp.lt.s32.totalorder %s227_s5, %s227_s5 }
  0xf3   :  { %p234_p11 = por %p233_p10, %p232_p9 }
  0xf5   :  { %p235_p12 = pnand %p234_p11, %p228_p8 }
 0x1b8   :  { %v134_v30 = vpop.f32.mrb[0].mxu1 }
 0x1b9   :  { %v135_v31 = vadd.f32 %v171_v29, %v134_v30  ;;  %v199_v32 = vpop.f32.mrb[1].mxu1 }
 0x1ba   :  { %v137_v33 = vpop.f32.mrb[2].mxu1 }
 0x1bb   :  { %140 = vst.msk [vmem:[#allocation4] sm:$0xff] %vm32_vm1, %v135_v31  ;;  %v200_v34 = vpop.f32.mrb[3].mxu1 }
 0x1bc   :  { %238 = shalt.err (!%p235_p12)
}
 0x1bd   :  { %s239_s2 = scalar_lea.hbm %s357_s4, 128 }
 0x1be   :  { %p240_p13 = scmp.ne.s32.totalorder %s357_s4, %s239_s2  ;;  %p243_p0 = scmp.lt.u32.totalorder %s239_s2, %s357_s4 }
 0x1c0   :  { %p245_p1 = pnand %p243_p0, %p240_p13 }
 0x1c2   :  { %248 = shalt.err (!%p245_p1)
}
 0x1c3   :  { %160 = dma.vmem_to_hbm [thread:$0]  %s158_s30, 128, %s357_s4, [#allocation5]  }
 0x1c4   :  { %249 = dma.done.wait [#allocation3], 128  }
 0x1c5   :  { %250 = vsyncadd [#allocation3], 4294967168 }
 0x1c6   :  { %251 = dma.done.wait [#allocation5], 128  }
 0x1c7   :  { %252 = vsyncadd [#allocation5], 4294967168 }
 0x1c8   :  { %167 = vsyncpa [#allocation3], 1 }
 0x1c9   :  { %168 = vsyncpa [#allocation5], 1 }

</bundles_post_ra>
